<compile_context>
chip_gen: v5e
topology: v5e:2x2
jax: 0.10.0
libtpu: 0.0.40
codegen_flags: <defaults>
</compile_context>

<pallas_src>
import functools

import numpy as np
import jax
import jax.numpy as jnp
from jax.experimental import pallas as pl
from jax.experimental.pallas import tpu as pltpu

EPS = 1e-5          # PyTorch InstanceNorm2d default eps
NEG_SLOPE = 0.01    # PyTorch LeakyReLU default negative_slope

_TAPS = tuple((dy, dx) for dy in range(3) for dx in range(3))


def _make_tap_masks(H, W):
    """(9, 1, H*W) f32 multiplicative masks: zero where tap (dy, dx) would read
    outside the zero-padded image.  Built host-side once and passed as a tiny
    constant-index-map kernel input (avoids in-kernel iota div/mod and any
    per-loop mask rebuilds)."""
    HW = H * W
    r = np.arange(HW) // W
    c = np.arange(HW) % W
    m = np.ones((9, HW), np.float32)
    for t, (dy, dx) in enumerate(_TAPS):
        ok = np.ones(HW, bool)
        if dy == 0:
            ok &= r >= 1
        if dy == 2:
            ok &= r <= H - 2
        if dx == 0:
            ok &= c >= 1
        if dx == 2:
            ok &= c <= W - 2
        m[t] = ok.astype(np.float32)
    return jnp.asarray(m.reshape(9, 1, HW))


def _instance_norm_lrelu(z, inv_hw):
    """z: (C, HW) f32.  One-pass InstanceNorm (affine=False, biased variance)
    over the spatial (lane) axis, then LeakyReLU(0.01).  rsqrt runs on the EUP
    slot (effectively free next to VPU work)."""
    s = jnp.sum(z, axis=1, keepdims=True)
    sq = jnp.sum(z * z, axis=1, keepdims=True)
    mean = s * inv_hw
    var = jnp.maximum(sq * inv_hw - mean * mean, 0.0)
    y = (z - mean) * jax.lax.rsqrt(var + EPS)
    return jnp.where(y >= 0, y, NEG_SLOPE * y)


def double_conv_kernel(H, W, use_bf16_mxu,
                       mask_ref, x_ref, w1_ref, w2_ref, o_ref):
    # mask_ref: (9, 1, HW)         0/1 boundary masks, one per 3x3 tap
    # x_ref   : (B_blk, Cp, HW)    lane-dense images (spatial HW on lanes)
    # w1_ref  : (Coutp, 9*Cp)      im2col-reshaped conv1 weights
    # w2_ref  : (Coutp, 9*Coutp)   im2col-reshaped conv2 weights
    # o_ref   : (B_blk, Coutp, HW)
    B = x_ref.shape[0]
    HW = H * W
    inv_hw = 1.0 / float(HW)

    # Hoisted once at kernel top; shared by both convs and all images.
    masks = [mask_ref[t] for t in range(9)]          # each (1, HW)

    def im2col(img):
        """img: (C, HW) -> (9*C, HW).  Row order (dy*3 + dx)*C + c matches the
        OIHW -> (O, Kh, Kw, I) weight reshape in the wrapper.  Each tap is a
        lane roll (XLU) + mask multiply (VPU): no padded scratch, no strided
        slices, no masked partial stores."""
        taps = []
        for t, (dy, dx) in enumerate(_TAPS):
            off = (dy - 1) * W + (dx - 1)
            tap = img if off == 0 else pltpu.roll(img, shift=(-off) % HW, axis=1)
            if (dy, dx) != (1, 1):
                tap = tap * masks[t]
            taps.append(tap)
        # C is padded to a multiple of 8 -> every tap block is sublane-aligned.
        return jnp.concatenate(taps, axis=0)

    def conv_in_lrelu(imgs, w):
        """imgs: list of B (C, HW).  One lane-stacked MXU matmul for the whole
        batch block: (Cout, 9C) @ (9C, B*HW); per-image InstanceNorm+LeakyReLU
        on lane-aligned slices (HW is a multiple of 128 -> static vreg picks)."""
        patch = jnp.concatenate([im2col(im) for im in imgs], axis=1)
        if use_bf16_mxu:
            z = jnp.dot(w.astype(jnp.bfloat16), patch.astype(jnp.bfloat16),
                        preferred_element_type=jnp.float32)
        else:
            z = jnp.dot(w, patch, preferred_element_type=jnp.float32)
        return [_instance_norm_lrelu(z[:, b * HW:(b + 1) * HW], inv_hw)
                for b in range(B)]

    y1 = conv_in_lrelu([x_ref[b] for b in range(B)], w1_ref[...])
    y2 = conv_in_lrelu(y1, w2_ref[...])
    for b in range(B):
        # Lane-dense store: last dim HW is a multiple of 128, already NCHW order.
        o_ref[b] = y2[b].astype(o_ref.dtype)


def _round_up(v, m):
    return (v + m - 1) // m * m


def _vmem_limit_bytes(B_blk, Cp, Coutp, HW):
    """Budget derived from actual buffer sizes instead of a stale constant."""
    f32 = 4
    in_blk = B_blk * Cp * HW * f32
    out_blk = B_blk * Coutp * HW * f32
    weights = (Coutp * 9 * Cp + Coutp * 9 * Coutp) * f32
    masks = 9 * 8 * HW * f32                              # (9,1,HW) sublane-padded
    patches = (9 * Cp + 9 * Coutp) * B_blk * HW * f32     # live im2col matrices
    acts = (Cp + 2 * Coutp) * B_blk * HW * f32            # taps / activations
    need = 2 * (in_blk + out_blk + weights + masks) + patches + acts
    # Generous headroom for compiler temporaries; stay well below v7x's 64 MiB
    # physical VMEM (128 MiB on v5e/v6e) so double-buffering never collapses.
    return int(min(max(4 * need, 16 << 20), 48 << 20))


def double_conv_2(x_nchw, w1_oihw, b1, w2_oihw, b2, *,
                  batch_block=8, use_bf16_mxu=False):
    """x_nchw: (N, Cin, H, W) f32.  Weights in PyTorch OIHW layout.
    Returns (N, Cout, H, W).

    b1/b2 are accepted for API parity with the PyTorch module but intentionally
    ignored: a per-channel conv bias followed by InstanceNorm2d(affine=False)
    is exactly cancelled (mean-subtract removes it, variance unchanged).
    NOTE: this shortcut breaks if the norm ever becomes affine / BatchNorm.
    """
    del b1, b2
    N, Cin, H, W = x_nchw.shape
    Cout = w1_oihw.shape[0]
    HW = H * W

    Cp = _round_up(Cin, 8)        # sublane-aligned tap blocks
    Coutp = _round_up(Cout, 8)
    B_blk = min(batch_block, N)
    Np = _round_up(N, B_blk)

    # Free row-major reshape; zero-pad channels/batch (exact: zero channels pair
    # with zero weight columns; padded images are sliced off below).
    x = x_nchw.reshape(N, Cin, HW).astype(jnp.float32)
    if (Np, Cp) != (N, Cin):
        x = jnp.zeros((Np, Cp, HW), jnp.float32).at[:N, :Cin].set(x)

    # Weights -> im2col layout: column index (dy*3 + dx)*C + c.
    w1p = jnp.zeros((Coutp, Cp, 3, 3), jnp.float32).at[:Cout, :Cin].set(
        w1_oihw.astype(jnp.float32))
    w2p = jnp.zeros((Coutp, Coutp, 3, 3), jnp.float32).at[:Cout, :Cout].set(
        w2_oihw.astype(jnp.float32))
    w1r = jnp.transpose(w1p, (0, 2, 3, 1)).reshape(Coutp, 9 * Cp)
    w2r = jnp.transpose(w2p, (0, 2, 3, 1)).reshape(Coutp, 9 * Coutp)

    masks = _make_tap_masks(H, W)

    kernel = functools.partial(double_conv_kernel, H, W, use_bf16_mxu)

    out = pl.pallas_call(
        kernel,
        out_shape=jax.ShapeDtypeStruct((Np, Coutp, HW), jnp.float32),
        grid_spec=pltpu.PrefetchScalarGridSpec(
            num_scalar_prefetch=0,
            grid=(Np // B_blk,),
            in_specs=[
                pl.BlockSpec((9, 1, HW), lambda n: (0, 0, 0)),
                pl.BlockSpec((B_blk, Cp, HW), lambda n: (n, 0, 0)),
                pl.BlockSpec((Coutp, 9 * Cp), lambda n: (0, 0)),
                pl.BlockSpec((Coutp, 9 * Coutp), lambda n: (0, 0)),
            ],
            out_specs=pl.BlockSpec((B_blk, Coutp, HW), lambda n: (n, 0, 0)),
        ),
        compiler_params=pltpu.CompilerParams(
            # Batch blocks are independent -> shard across v7x TensorCores.
            dimension_semantics=("parallel",),
            vmem_limit_bytes=_vmem_limit_bytes(B_blk, Cp, Coutp, HW),
            # TODO(synk): for large UNet stages (e.g. 256x256, C>=64) tile H into
            # row strips (halo handled by extra row-rolls/masks) and size the
            # strip so the live 9C x strip*W im2col + 2x-buffered blocks fit
            # ~28-30 MiB on v7x (64 MiB VMEM) vs ~56 MiB usable on v5e/v6e.
        ),
    )(masks, x, w1r, w2r)

    return out[:N, :Cout].reshape(N, Cout, H, W)


def _ref_forward(x_nchw, w1, b1, w2, b2):
    """Pure-JAX reference (lax conv WITH bias + instance norm + leaky relu).
    Keeping the biases here also validates that dropping them in the kernel is
    numerically a no-op."""

    def conv(x, w, b):
        y = jax.lax.conv_general_dilated(
            x, w, window_strides=(1, 1), padding="SAME",
            dimension_numbers=("NCHW", "OIHW", "NCHW"))
        return y + b.reshape(1, -1, 1, 1)

    def inorm_lrelu(y):
        mean = jnp.mean(y, axis=(2, 3), keepdims=True)
        var = jnp.mean((y - mean) ** 2, axis=(2, 3), keepdims=True)
        z = (y - mean) * jax.lax.rsqrt(var + EPS)
        return jnp.where(z >= 0, z, NEG_SLOPE * z)

    y = inorm_lrelu(conv(x_nchw, w1, b1))
    y = inorm_lrelu(conv(y, w2, b2))
    return y


if __name__ == "__main__":
    # Small shapes consistent with the module: batch=2, in_channels=4,
    # out_channels=8, spatial=16x16.
    N, CIN, COUT, H, W = 2, 4, 8, 16, 16

    key = jax.random.PRNGKey(0)
    kx, kw1, kb1, kw2, kb2 = jax.random.split(key, 5)

    x = jax.random.normal(kx, (N, CIN, H, W), jnp.float32)
    # PyTorch-layout (OIHW) synthetic parameters.
    w1 = 0.1 * jax.random.normal(kw1, (COUT, CIN, 3, 3), jnp.float32)
    b1 = 0.1 * jax.random.normal(kb1, (COUT,), jnp.float32)
    w2 = 0.1 * jax.random.normal(kw2, (COUT, COUT, 3, 3), jnp.float32)
    b2 = 0.1 * jax.random.normal(kb2, (COUT,), jnp.float32)

    out = jax.block_until_ready(double_conv_2(x, w1, b1, w2, b2))

    ref = jax.block_until_ready(_ref_forward(x, w1, b1, w2, b2))
    assert out.shape == (N, COUT, H, W), out.shape
    max_err = float(jnp.max(jnp.abs(out - ref)))
    assert jnp.allclose(out, ref, atol=2e-4, rtol=2e-4), max_err

    print("KERNEL_OK")
</pallas_src>

<mosaic_0001>
module attributes {stable_mosaic.version = 11 : i64} {
  func.func @double_conv_kernel(%arg0: i32, %arg1: memref<9x1x256xf32, #tpu.memory_space<vmem>>, %arg2: memref<2x8x256xf32, #tpu.memory_space<vmem>>, %arg3: memref<8x72xf32, #tpu.memory_space<vmem>>, %arg4: memref<8x72xf32, #tpu.memory_space<vmem>>, %arg5: memref<2x8x256xf32, #tpu.memory_space<vmem>>) attributes {dimension_semantics = [#tpu.dimension_semantics<parallel>], iteration_bounds = array<i64: 1>, scalar_prefetch = 0 : i64, scratch_operands = 0 : i64, tpu.core_type = #tpu.core_type<tc>, window_params = [{pipeline_mode = #tpu.pipeline_mode<synchronous>, transform_indices = @transform_0, window_bounds = array<i64: 9, 1, 256>}, {transform_indices = @transform_1, window_bounds = array<i64: 2, 8, 256>}, {pipeline_mode = #tpu.pipeline_mode<synchronous>, transform_indices = @transform_2, window_bounds = array<i64: 8, 72>}, {pipeline_mode = #tpu.pipeline_mode<synchronous>, transform_indices = @transform_3, window_bounds = array<i64: 8, 72>}, {transform_indices = @transform_4, window_bounds = array<i64: 2, 8, 256>}]} {
    %c0 = arith.constant 0 : index
    %c0_0 = arith.constant 0 : index
    %c0_1 = arith.constant 0 : index
    %0 = vector.load %arg1[%c0, %c0_0, %c0_1] : memref<9x1x256xf32, #tpu.memory_space<vmem>>, vector<1x1x256xf32>
    %1 = vector.shape_cast %0 : vector<1x1x256xf32> to vector<1x256xf32>
    %c1 = arith.constant 1 : index
    %c0_2 = arith.constant 0 : index
    %c0_3 = arith.constant 0 : index
    %2 = vector.load %arg1[%c1, %c0_2, %c0_3] : memref<9x1x256xf32, #tpu.memory_space<vmem>>, vector<1x1x256xf32>
    %3 = vector.shape_cast %2 : vector<1x1x256xf32> to vector<1x256xf32>
    %c2 = arith.constant 2 : index
    %c0_4 = arith.constant 0 : index
    %c0_5 = arith.constant 0 : index
    %4 = vector.load %arg1[%c2, %c0_4, %c0_5] : memref<9x1x256xf32, #tpu.memory_space<vmem>>, vector<1x1x256xf32>
    %5 = vector.shape_cast %4 : vector<1x1x256xf32> to vector<1x256xf32>
    %c3 = arith.constant 3 : index
    %c0_6 = arith.constant 0 : index
    %c0_7 = arith.constant 0 : index
    %6 = vector.load %arg1[%c3, %c0_6, %c0_7] : memref<9x1x256xf32, #tpu.memory_space<vmem>>, vector<1x1x256xf32>
    %7 = vector.shape_cast %6 : vector<1x1x256xf32> to vector<1x256xf32>
    %c5 = arith.constant 5 : index
    %c0_8 = arith.constant 0 : index
    %c0_9 = arith.constant 0 : index
    %8 = vector.load %arg1[%c5, %c0_8, %c0_9] : memref<9x1x256xf32, #tpu.memory_space<vmem>>, vector<1x1x256xf32>
    %9 = vector.shape_cast %8 : vector<1x1x256xf32> to vector<1x256xf32>
    %c6 = arith.constant 6 : index
    %c0_10 = arith.constant 0 : index
    %c0_11 = arith.constant 0 : index
    %10 = vector.load %arg1[%c6, %c0_10, %c0_11] : memref<9x1x256xf32, #tpu.memory_space<vmem>>, vector<1x1x256xf32>
    %11 = vector.shape_cast %10 : vector<1x1x256xf32> to vector<1x256xf32>
    %c7 = arith.constant 7 : index
    %c0_12 = arith.constant 0 : index
    %c0_13 = arith.constant 0 : index
    %12 = vector.load %arg1[%c7, %c0_12, %c0_13] : memref<9x1x256xf32, #tpu.memory_space<vmem>>, vector<1x1x256xf32>
    %13 = vector.shape_cast %12 : vector<1x1x256xf32> to vector<1x256xf32>
    %c8 = arith.constant 8 : index
    %c0_14 = arith.constant 0 : index
    %c0_15 = arith.constant 0 : index
    %14 = vector.load %arg1[%c8, %c0_14, %c0_15] : memref<9x1x256xf32, #tpu.memory_space<vmem>>, vector<1x1x256xf32>
    %15 = vector.shape_cast %14 : vector<1x1x256xf32> to vector<1x256xf32>
    %c0_16 = arith.constant 0 : index
    %c0_17 = arith.constant 0 : index
    %c0_18 = arith.constant 0 : index
    %16 = vector.load %arg2[%c0_16, %c0_17, %c0_18] : memref<2x8x256xf32, #tpu.memory_space<vmem>>, vector<1x8x256xf32>
    %17 = vector.shape_cast %16 : vector<1x8x256xf32> to vector<8x256xf32>
    %c1_19 = arith.constant 1 : index
    %c0_20 = arith.constant 0 : index
    %c0_21 = arith.constant 0 : index
    %18 = vector.load %arg2[%c1_19, %c0_20, %c0_21] : memref<2x8x256xf32, #tpu.memory_space<vmem>>, vector<1x8x256xf32>
    %19 = vector.shape_cast %18 : vector<1x8x256xf32> to vector<8x256xf32>
    %c0_22 = arith.constant 0 : index
    %c0_23 = arith.constant 0 : index
    %20 = vector.load %arg3[%c0_22, %c0_23] : memref<8x72xf32, #tpu.memory_space<vmem>>, vector<8x72xf32>
    %c17_i32 = arith.constant 17 : i32
    %21 = tpu.dynamic_rotate %17 by %c17_i32 dim 1 : vector<8x256xf32>, i32 -> vector<8x256xf32>
    %22 = vector.broadcast %1 : vector<1x256xf32> to vector<8x256xf32>
    %23 = arith.mulf %21, %22 : vector<8x256xf32>
    %c16_i32 = arith.constant 16 : i32
    %24 = tpu.dynamic_rotate %17 by %c16_i32 dim 1 : vector<8x256xf32>, i32 -> vector<8x256xf32>
    %25 = vector.broadcast %3 : vector<1x256xf32> to vector<8x256xf32>
    %26 = arith.mulf %24, %25 : vector<8x256xf32>
    %c15_i32 = arith.constant 15 : i32
    %27 = tpu.dynamic_rotate %17 by %c15_i32 dim 1 : vector<8x256xf32>, i32 -> vector<8x256xf32>
    %28 = vector.broadcast %5 : vector<1x256xf32> to vector<8x256xf32>
    %29 = arith.mulf %27, %28 : vector<8x256xf32>
    %c1_i32 = arith.constant 1 : i32
    %30 = tpu.dynamic_rotate %17 by %c1_i32 dim 1 : vector<8x256xf32>, i32 -> vector<8x256xf32>
    %31 = vector.broadcast %7 : vector<1x256xf32> to vector<8x256xf32>
    %32 = arith.mulf %30, %31 : vector<8x256xf32>
    %c255_i32 = arith.constant 255 : i32
    %33 = tpu.dynamic_rotate %17 by %c255_i32 dim 1 : vector<8x256xf32>, i32 -> vector<8x256xf32>
    %34 = vector.broadcast %9 : vector<1x256xf32> to vector<8x256xf32>
    %35 = arith.mulf %33, %34 : vector<8x256xf32>
    %c241_i32 = arith.constant 241 : i32
    %36 = tpu.dynamic_rotate %17 by %c241_i32 dim 1 : vector<8x256xf32>, i32 -> vector<8x256xf32>
    %37 = vector.broadcast %11 : vector<1x256xf32> to vector<8x256xf32>
    %38 = arith.mulf %36, %37 : vector<8x256xf32>
    %c240_i32 = arith.constant 240 : i32
    %39 = tpu.dynamic_rotate %17 by %c240_i32 dim 1 : vector<8x256xf32>, i32 -> vector<8x256xf32>
    %40 = vector.broadcast %13 : vector<1x256xf32> to vector<8x256xf32>
    %41 = arith.mulf %39, %40 : vector<8x256xf32>
    %c239_i32 = arith.constant 239 : i32
    %42 = tpu.dynamic_rotate %17 by %c239_i32 dim 1 : vector<8x256xf32>, i32 -> vector<8x256xf32>
    %43 = vector.broadcast %15 : vector<1x256xf32> to vector<8x256xf32>
    %44 = arith.mulf %42, %43 : vector<8x256xf32>
    %45 = tpu.concatenate %23, %26, %29, %32, %17, %35, %38, %41, %44 in 0 : vector<8x256xf32>, vector<8x256xf32>, vector<8x256xf32>, vector<8x256xf32>, vector<8x256xf32>, vector<8x256xf32>, vector<8x256xf32>, vector<8x256xf32>, vector<8x256xf32> -> vector<72x256xf32>
    %c17_i32_24 = arith.constant 17 : i32
    %46 = tpu.dynamic_rotate %19 by %c17_i32_24 dim 1 : vector<8x256xf32>, i32 -> vector<8x256xf32>
    %47 = vector.broadcast %1 : vector<1x256xf32> to vector<8x256xf32>
    %48 = arith.mulf %46, %47 : vector<8x256xf32>
    %c16_i32_25 = arith.constant 16 : i32
    %49 = tpu.dynamic_rotate %19 by %c16_i32_25 dim 1 : vector<8x256xf32>, i32 -> vector<8x256xf32>
    %50 = vector.broadcast %3 : vector<1x256xf32> to vector<8x256xf32>
    %51 = arith.mulf %49, %50 : vector<8x256xf32>
    %c15_i32_26 = arith.constant 15 : i32
    %52 = tpu.dynamic_rotate %19 by %c15_i32_26 dim 1 : vector<8x256xf32>, i32 -> vector<8x256xf32>
    %53 = vector.broadcast %5 : vector<1x256xf32> to vector<8x256xf32>
    %54 = arith.mulf %52, %53 : vector<8x256xf32>
    %c1_i32_27 = arith.constant 1 : i32
    %55 = tpu.dynamic_rotate %19 by %c1_i32_27 dim 1 : vector<8x256xf32>, i32 -> vector<8x256xf32>
    %56 = vector.broadcast %7 : vector<1x256xf32> to vector<8x256xf32>
    %57 = arith.mulf %55, %56 : vector<8x256xf32>
    %c255_i32_28 = arith.constant 255 : i32
    %58 = tpu.dynamic_rotate %19 by %c255_i32_28 dim 1 : vector<8x256xf32>, i32 -> vector<8x256xf32>
    %59 = vector.broadcast %9 : vector<1x256xf32> to vector<8x256xf32>
    %60 = arith.mulf %58, %59 : vector<8x256xf32>
    %c241_i32_29 = arith.constant 241 : i32
    %61 = tpu.dynamic_rotate %19 by %c241_i32_29 dim 1 : vector<8x256xf32>, i32 -> vector<8x256xf32>
    %62 = vector.broadcast %11 : vector<1x256xf32> to vector<8x256xf32>
    %63 = arith.mulf %61, %62 : vector<8x256xf32>
    %c240_i32_30 = arith.constant 240 : i32
    %64 = tpu.dynamic_rotate %19 by %c240_i32_30 dim 1 : vector<8x256xf32>, i32 -> vector<8x256xf32>
    %65 = vector.broadcast %13 : vector<1x256xf32> to vector<8x256xf32>
    %66 = arith.mulf %64, %65 : vector<8x256xf32>
    %c239_i32_31 = arith.constant 239 : i32
    %67 = tpu.dynamic_rotate %19 by %c239_i32_31 dim 1 : vector<8x256xf32>, i32 -> vector<8x256xf32>
    %68 = vector.broadcast %15 : vector<1x256xf32> to vector<8x256xf32>
    %69 = arith.mulf %67, %68 : vector<8x256xf32>
    %70 = tpu.concatenate %48, %51, %54, %57, %19, %60, %63, %66, %69 in 0 : vector<8x256xf32>, vector<8x256xf32>, vector<8x256xf32>, vector<8x256xf32>, vector<8x256xf32>, vector<8x256xf32>, vector<8x256xf32>, vector<8x256xf32>, vector<8x256xf32> -> vector<72x256xf32>
    %71 = tpu.concatenate %45, %70 in 1 : vector<72x256xf32>, vector<72x256xf32> -> vector<72x512xf32>
    %cst = arith.constant dense<0.000000e+00> : vector<8x512xf32>
    %72 = tpu.matmul %20, %71, %cst {dimension_numbers = #tpu.dot_dimension_numbers<[1], [0], [0], [1], [0, 0, 1, 1], [], []>} : vector<8x72xf32>, vector<72x512xf32>, vector<8x512xf32> -> vector<8x512xf32>
    %73 = vector.extract_strided_slice %72 {offsets = [0, 0], sizes = [8, 256], strides = [1, 1]} : vector<8x512xf32> to vector<8x256xf32>
    %cst_32 = arith.constant dense<0.000000e+00> : vector<8xf32>
    %74 = vector.multi_reduction <add>, %73, %cst_32 [1] : vector<8x256xf32> to vector<8xf32>
    %75 = vector.shape_cast %74 : vector<8xf32> to vector<8x1xf32>
    %76 = arith.mulf %73, %73 : vector<8x256xf32>
    %cst_33 = arith.constant dense<0.000000e+00> : vector<8xf32>
    %77 = vector.multi_reduction <add>, %76, %cst_33 [1] : vector<8x256xf32> to vector<8xf32>
    %78 = vector.shape_cast %77 : vector<8xf32> to vector<8x1xf32>
    %cst_34 = arith.constant 3.906250e-03 : f32
    %79 = vector.broadcast %cst_34 : f32 to vector<8x1xf32>
    %80 = arith.mulf %75, %79 : vector<8x1xf32>
    %cst_35 = arith.constant 3.906250e-03 : f32
    %81 = vector.broadcast %cst_35 : f32 to vector<8x1xf32>
    %82 = arith.mulf %78, %81 : vector<8x1xf32>
    %83 = arith.mulf %80, %80 : vector<8x1xf32>
    %84 = arith.subf %82, %83 : vector<8x1xf32>
    %cst_36 = arith.constant 0.000000e+00 : f32
    %85 = vector.broadcast %cst_36 : f32 to vector<8x1xf32>
    %86 = arith.maximumf %84, %85 : vector<8x1xf32>
    %87 = vector.broadcast %80 : vector<8x1xf32> to vector<8x256xf32>
    %88 = arith.subf %73, %87 : vector<8x256xf32>
    %cst_37 = arith.constant 9.99999974E-6 : f32
    %89 = vector.broadcast %cst_37 : f32 to vector<8x1xf32>
    %90 = arith.addf %86, %89 : vector<8x1xf32>
    %91 = math.rsqrt %90 : vector<8x1xf32>
    %92 = vector.broadcast %91 : vector<8x1xf32> to vector<8x256xf32>
    %93 = arith.mulf %88, %92 : vector<8x256xf32>
    %cst_38 = arith.constant 0.000000e+00 : f32
    %94 = vector.broadcast %cst_38 : f32 to vector<8x256xf32>
    %95 = arith.cmpf oge, %93, %94 : vector<8x256xf32>
    %cst_39 = arith.constant 0.00999999977 : f32
    %96 = vector.broadcast %cst_39 : f32 to vector<8x256xf32>
    %97 = arith.mulf %96, %93 : vector<8x256xf32>
    %98 = arith.select %95, %93, %97 : vector<8x256xi1>, vector<8x256xf32>
    %99 = vector.extract_strided_slice %72 {offsets = [0, 256], sizes = [8, 256], strides = [1, 1]} : vector<8x512xf32> to vector<8x256xf32>
    %cst_40 = arith.constant dense<0.000000e+00> : vector<8xf32>
    %100 = vector.multi_reduction <add>, %99, %cst_40 [1] : vector<8x256xf32> to vector<8xf32>
    %101 = vector.shape_cast %100 : vector<8xf32> to vector<8x1xf32>
    %102 = arith.mulf %99, %99 : vector<8x256xf32>
    %cst_41 = arith.constant dense<0.000000e+00> : vector<8xf32>
    %103 = vector.multi_reduction <add>, %102, %cst_41 [1] : vector<8x256xf32> to vector<8xf32>
    %104 = vector.shape_cast %103 : vector<8xf32> to vector<8x1xf32>
    %cst_42 = arith.constant 3.906250e-03 : f32
    %105 = vector.broadcast %cst_42 : f32 to vector<8x1xf32>
    %106 = arith.mulf %101, %105 : vector<8x1xf32>
    %cst_43 = arith.constant 3.906250e-03 : f32
    %107 = vector.broadcast %cst_43 : f32 to vector<8x1xf32>
    %108 = arith.mulf %104, %107 : vector<8x1xf32>
    %109 = arith.mulf %106, %106 : vector<8x1xf32>
    %110 = arith.subf %108, %109 : vector<8x1xf32>
    %cst_44 = arith.constant 0.000000e+00 : f32
    %111 = vector.broadcast %cst_44 : f32 to vector<8x1xf32>
    %112 = arith.maximumf %110, %111 : vector<8x1xf32>
    %113 = vector.broadcast %106 : vector<8x1xf32> to vector<8x256xf32>
    %114 = arith.subf %99, %113 : vector<8x256xf32>
    %cst_45 = arith.constant 9.99999974E-6 : f32
    %115 = vector.broadcast %cst_45 : f32 to vector<8x1xf32>
    %116 = arith.addf %112, %115 : vector<8x1xf32>
    %117 = math.rsqrt %116 : vector<8x1xf32>
    %118 = vector.broadcast %117 : vector<8x1xf32> to vector<8x256xf32>
    %119 = arith.mulf %114, %118 : vector<8x256xf32>
    %cst_46 = arith.constant 0.000000e+00 : f32
    %120 = vector.broadcast %cst_46 : f32 to vector<8x256xf32>
    %121 = arith.cmpf oge, %119, %120 : vector<8x256xf32>
    %cst_47 = arith.constant 0.00999999977 : f32
    %122 = vector.broadcast %cst_47 : f32 to vector<8x256xf32>
    %123 = arith.mulf %122, %119 : vector<8x256xf32>
    %124 = arith.select %121, %119, %123 : vector<8x256xi1>, vector<8x256xf32>
    %c0_48 = arith.constant 0 : index
    %c0_49 = arith.constant 0 : index
    %125 = vector.load %arg4[%c0_48, %c0_49] : memref<8x72xf32, #tpu.memory_space<vmem>>, vector<8x72xf32>
    %c17_i32_50 = arith.constant 17 : i32
    %126 = tpu.dynamic_rotate %98 by %c17_i32_50 dim 1 : vector<8x256xf32>, i32 -> vector<8x256xf32>
    %127 = vector.broadcast %1 : vector<1x256xf32> to vector<8x256xf32>
    %128 = arith.mulf %126, %127 : vector<8x256xf32>
    %c16_i32_51 = arith.constant 16 : i32
    %129 = tpu.dynamic_rotate %98 by %c16_i32_51 dim 1 : vector<8x256xf32>, i32 -> vector<8x256xf32>
    %130 = vector.broadcast %3 : vector<1x256xf32> to vector<8x256xf32>
    %131 = arith.mulf %129, %130 : vector<8x256xf32>
    %c15_i32_52 = arith.constant 15 : i32
    %132 = tpu.dynamic_rotate %98 by %c15_i32_52 dim 1 : vector<8x256xf32>, i32 -> vector<8x256xf32>
    %133 = vector.broadcast %5 : vector<1x256xf32> to vector<8x256xf32>
    %134 = arith.mulf %132, %133 : vector<8x256xf32>
    %c1_i32_53 = arith.constant 1 : i32
    %135 = tpu.dynamic_rotate %98 by %c1_i32_53 dim 1 : vector<8x256xf32>, i32 -> vector<8x256xf32>
    %136 = vector.broadcast %7 : vector<1x256xf32> to vector<8x256xf32>
    %137 = arith.mulf %135, %136 : vector<8x256xf32>
    %c255_i32_54 = arith.constant 255 : i32
    %138 = tpu.dynamic_rotate %98 by %c255_i32_54 dim 1 : vector<8x256xf32>, i32 -> vector<8x256xf32>
    %139 = vector.broadcast %9 : vector<1x256xf32> to vector<8x256xf32>
    %140 = arith.mulf %138, %139 : vector<8x256xf32>
    %c241_i32_55 = arith.constant 241 : i32
    %141 = tpu.dynamic_rotate %98 by %c241_i32_55 dim 1 : vector<8x256xf32>, i32 -> vector<8x256xf32>
    %142 = vector.broadcast %11 : vector<1x256xf32> to vector<8x256xf32>
    %143 = arith.mulf %141, %142 : vector<8x256xf32>
    %c240_i32_56 = arith.constant 240 : i32
    %144 = tpu.dynamic_rotate %98 by %c240_i32_56 dim 1 : vector<8x256xf32>, i32 -> vector<8x256xf32>
    %145 = vector.broadcast %13 : vector<1x256xf32> to vector<8x256xf32>
    %146 = arith.mulf %144, %145 : vector<8x256xf32>
    %c239_i32_57 = arith.constant 239 : i32
    %147 = tpu.dynamic_rotate %98 by %c239_i32_57 dim 1 : vector<8x256xf32>, i32 -> vector<8x256xf32>
    %148 = vector.broadcast %15 : vector<1x256xf32> to vector<8x256xf32>
    %149 = arith.mulf %147, %148 : vector<8x256xf32>
    %150 = tpu.concatenate %128, %131, %134, %137, %98, %140, %143, %146, %149 in 0 : vector<8x256xf32>, vector<8x256xf32>, vector<8x256xf32>, vector<8x256xf32>, vector<8x256xf32>, vector<8x256xf32>, vector<8x256xf32>, vector<8x256xf32>, vector<8x256xf32> -> vector<72x256xf32>
    %c17_i32_58 = arith.constant 17 : i32
    %151 = tpu.dynamic_rotate %124 by %c17_i32_58 dim 1 : vector<8x256xf32>, i32 -> vector<8x256xf32>
    %152 = vector.broadcast %1 : vector<1x256xf32> to vector<8x256xf32>
    %153 = arith.mulf %151, %152 : vector<8x256xf32>
    %c16_i32_59 = arith.constant 16 : i32
    %154 = tpu.dynamic_rotate %124 by %c16_i32_59 dim 1 : vector<8x256xf32>, i32 -> vector<8x256xf32>
    %155 = vector.broadcast %3 : vector<1x256xf32> to vector<8x256xf32>
    %156 = arith.mulf %154, %155 : vector<8x256xf32>
    %c15_i32_60 = arith.constant 15 : i32
    %157 = tpu.dynamic_rotate %124 by %c15_i32_60 dim 1 : vector<8x256xf32>, i32 -> vector<8x256xf32>
    %158 = vector.broadcast %5 : vector<1x256xf32> to vector<8x256xf32>
    %159 = arith.mulf %157, %158 : vector<8x256xf32>
    %c1_i32_61 = arith.constant 1 : i32
    %160 = tpu.dynamic_rotate %124 by %c1_i32_61 dim 1 : vector<8x256xf32>, i32 -> vector<8x256xf32>
    %161 = vector.broadcast %7 : vector<1x256xf32> to vector<8x256xf32>
    %162 = arith.mulf %160, %161 : vector<8x256xf32>
    %c255_i32_62 = arith.constant 255 : i32
    %163 = tpu.dynamic_rotate %124 by %c255_i32_62 dim 1 : vector<8x256xf32>, i32 -> vector<8x256xf32>
    %164 = vector.broadcast %9 : vector<1x256xf32> to vector<8x256xf32>
    %165 = arith.mulf %163, %164 : vector<8x256xf32>
    %c241_i32_63 = arith.constant 241 : i32
    %166 = tpu.dynamic_rotate %124 by %c241_i32_63 dim 1 : vector<8x256xf32>, i32 -> vector<8x256xf32>
    %167 = vector.broadcast %11 : vector<1x256xf32> to vector<8x256xf32>
    %168 = arith.mulf %166, %167 : vector<8x256xf32>
    %c240_i32_64 = arith.constant 240 : i32
    %169 = tpu.dynamic_rotate %124 by %c240_i32_64 dim 1 : vector<8x256xf32>, i32 -> vector<8x256xf32>
    %170 = vector.broadcast %13 : vector<1x256xf32> to vector<8x256xf32>
    %171 = arith.mulf %169, %170 : vector<8x256xf32>
    %c239_i32_65 = arith.constant 239 : i32
    %172 = tpu.dynamic_rotate %124 by %c239_i32_65 dim 1 : vector<8x256xf32>, i32 -> vector<8x256xf32>
    %173 = vector.broadcast %15 : vector<1x256xf32> to vector<8x256xf32>
    %174 = arith.mulf %172, %173 : vector<8x256xf32>
    %175 = tpu.concatenate %153, %156, %159, %162, %124, %165, %168, %171, %174 in 0 : vector<8x256xf32>, vector<8x256xf32>, vector<8x256xf32>, vector<8x256xf32>, vector<8x256xf32>, vector<8x256xf32>, vector<8x256xf32>, vector<8x256xf32>, vector<8x256xf32> -> vector<72x256xf32>
    %176 = tpu.concatenate %150, %175 in 1 : vector<72x256xf32>, vector<72x256xf32> -> vector<72x512xf32>
    %cst_66 = arith.constant dense<0.000000e+00> : vector<8x512xf32>
    %177 = tpu.matmul %125, %176, %cst_66 {dimension_numbers = #tpu.dot_dimension_numbers<[1], [0], [0], [1], [0, 0, 1, 1], [], []>} : vector<8x72xf32>, vector<72x512xf32>, vector<8x512xf32> -> vector<8x512xf32>
    %178 = vector.extract_strided_slice %177 {offsets = [0, 0], sizes = [8, 256], strides = [1, 1]} : vector<8x512xf32> to vector<8x256xf32>
    %cst_67 = arith.constant dense<0.000000e+00> : vector<8xf32>
    %179 = vector.multi_reduction <add>, %178, %cst_67 [1] : vector<8x256xf32> to vector<8xf32>
    %180 = vector.shape_cast %179 : vector<8xf32> to vector<8x1xf32>
    %181 = arith.mulf %178, %178 : vector<8x256xf32>
    %cst_68 = arith.constant dense<0.000000e+00> : vector<8xf32>
    %182 = vector.multi_reduction <add>, %181, %cst_68 [1] : vector<8x256xf32> to vector<8xf32>
    %183 = vector.shape_cast %182 : vector<8xf32> to vector<8x1xf32>
    %cst_69 = arith.constant 3.906250e-03 : f32
    %184 = vector.broadcast %cst_69 : f32 to vector<8x1xf32>
    %185 = arith.mulf %180, %184 : vector<8x1xf32>
    %cst_70 = arith.constant 3.906250e-03 : f32
    %186 = vector.broadcast %cst_70 : f32 to vector<8x1xf32>
    %187 = arith.mulf %183, %186 : vector<8x1xf32>
    %188 = arith.mulf %185, %185 : vector<8x1xf32>
    %189 = arith.subf %187, %188 : vector<8x1xf32>
    %cst_71 = arith.constant 0.000000e+00 : f32
    %190 = vector.broadcast %cst_71 : f32 to vector<8x1xf32>
    %191 = arith.maximumf %189, %190 : vector<8x1xf32>
    %192 = vector.broadcast %185 : vector<8x1xf32> to vector<8x256xf32>
    %193 = arith.subf %178, %192 : vector<8x256xf32>
    %cst_72 = arith.constant 9.99999974E-6 : f32
    %194 = vector.broadcast %cst_72 : f32 to vector<8x1xf32>
    %195 = arith.addf %191, %194 : vector<8x1xf32>
    %196 = math.rsqrt %195 : vector<8x1xf32>
    %197 = vector.broadcast %196 : vector<8x1xf32> to vector<8x256xf32>
    %198 = arith.mulf %193, %197 : vector<8x256xf32>
    %cst_73 = arith.constant 0.000000e+00 : f32
    %199 = vector.broadcast %cst_73 : f32 to vector<8x256xf32>
    %200 = arith.cmpf oge, %198, %199 : vector<8x256xf32>
    %cst_74 = arith.constant 0.00999999977 : f32
    %201 = vector.broadcast %cst_74 : f32 to vector<8x256xf32>
    %202 = arith.mulf %201, %198 : vector<8x256xf32>
    %203 = arith.select %200, %198, %202 : vector<8x256xi1>, vector<8x256xf32>
    %204 = vector.extract_strided_slice %177 {offsets = [0, 256], sizes = [8, 256], strides = [1, 1]} : vector<8x512xf32> to vector<8x256xf32>
    %cst_75 = arith.constant dense<0.000000e+00> : vector<8xf32>
    %205 = vector.multi_reduction <add>, %204, %cst_75 [1] : vector<8x256xf32> to vector<8xf32>
    %206 = vector.shape_cast %205 : vector<8xf32> to vector<8x1xf32>
    %207 = arith.mulf %204, %204 : vector<8x256xf32>
    %cst_76 = arith.constant dense<0.000000e+00> : vector<8xf32>
    %208 = vector.multi_reduction <add>, %207, %cst_76 [1] : vector<8x256xf32> to vector<8xf32>
    %209 = vector.shape_cast %208 : vector<8xf32> to vector<8x1xf32>
    %cst_77 = arith.constant 3.906250e-03 : f32
    %210 = vector.broadcast %cst_77 : f32 to vector<8x1xf32>
    %211 = arith.mulf %206, %210 : vector<8x1xf32>
    %cst_78 = arith.constant 3.906250e-03 : f32
    %212 = vector.broadcast %cst_78 : f32 to vector<8x1xf32>
    %213 = arith.mulf %209, %212 : vector<8x1xf32>
    %214 = arith.mulf %211, %211 : vector<8x1xf32>
    %215 = arith.subf %213, %214 : vector<8x1xf32>
    %cst_79 = arith.constant 0.000000e+00 : f32
    %216 = vector.broadcast %cst_79 : f32 to vector<8x1xf32>
    %217 = arith.maximumf %215, %216 : vector<8x1xf32>
    %218 = vector.broadcast %211 : vector<8x1xf32> to vector<8x256xf32>
    %219 = arith.subf %204, %218 : vector<8x256xf32>
    %cst_80 = arith.constant 9.99999974E-6 : f32
    %220 = vector.broadcast %cst_80 : f32 to vector<8x1xf32>
    %221 = arith.addf %217, %220 : vector<8x1xf32>
    %222 = math.rsqrt %221 : vector<8x1xf32>
    %223 = vector.broadcast %222 : vector<8x1xf32> to vector<8x256xf32>
    %224 = arith.mulf %219, %223 : vector<8x256xf32>
    %cst_81 = arith.constant 0.000000e+00 : f32
    %225 = vector.broadcast %cst_81 : f32 to vector<8x256xf32>
    %226 = arith.cmpf oge, %224, %225 : vector<8x256xf32>
    %cst_82 = arith.constant 0.00999999977 : f32
    %227 = vector.broadcast %cst_82 : f32 to vector<8x256xf32>
    %228 = arith.mulf %227, %224 : vector<8x256xf32>
    %229 = arith.select %226, %224, %228 : vector<8x256xi1>, vector<8x256xf32>
    %c0_83 = arith.constant 0 : index
    %c0_84 = arith.constant 0 : index
    %c0_85 = arith.constant 0 : index
    %230 = vector.load %arg5[%c0_83, %c0_84, %c0_85] : memref<2x8x256xf32, #tpu.memory_space<vmem>>, vector<1x8x256xf32>
    %231 = vector.shape_cast %230 : vector<1x8x256xf32> to vector<8x256xf32>
    %232 = vector.shape_cast %203 : vector<8x256xf32> to vector<1x8x256xf32>
    tpu.vector_store %arg5[%c0_83, %c0_84, %c0_85], %232 {strides = array<i32>} : memref<2x8x256xf32, #tpu.memory_space<vmem>>, vector<1x8x256xf32>,
    %c1_86 = arith.constant 1 : index
    %c0_87 = arith.constant 0 : index
    %c0_88 = arith.constant 0 : index
    %233 = vector.load %arg5[%c1_86, %c0_87, %c0_88] : memref<2x8x256xf32, #tpu.memory_space<vmem>>, vector<1x8x256xf32>
    %234 = vector.shape_cast %233 : vector<1x8x256xf32> to vector<8x256xf32>
    %235 = vector.shape_cast %229 : vector<8x256xf32> to vector<1x8x256xf32>
    tpu.vector_store %arg5[%c1_86, %c0_87, %c0_88], %235 {strides = array<i32>} : memref<2x8x256xf32, #tpu.memory_space<vmem>>, vector<1x8x256xf32>,
    return
  }
  func.func @transform_0(%arg0: i32) -> (i32, i32, i32) {
    %c0_i32 = arith.constant 0 : i32
    %c0_i32_0 = arith.constant 0 : i32
    %c0_i32_1 = arith.constant 0 : i32
    %c0_i32_2 = arith.constant 0 : i32
    return %c0_i32, %c0_i32_0, %c0_i32_1 : i32, i32, i32
  }
  func.func @transform_1(%arg0: i32) -> (i32, i32, i32) {
    %c0_i32 = arith.constant 0 : i32
    %c0_i32_0 = arith.constant 0 : i32
    %c0_i32_1 = arith.constant 0 : i32
    return %arg0, %c0_i32, %c0_i32_0 : i32, i32, i32
  }
  func.func @transform_2(%arg0: i32) -> (i32, i32) {
    %c0_i32 = arith.constant 0 : i32
    %c0_i32_0 = arith.constant 0 : i32
    %c0_i32_1 = arith.constant 0 : i32
    return %c0_i32, %c0_i32_0 : i32, i32
  }
  func.func @transform_3(%arg0: i32) -> (i32, i32) {
    %c0_i32 = arith.constant 0 : i32
    %c0_i32_0 = arith.constant 0 : i32
    %c0_i32_1 = arith.constant 0 : i32
    return %c0_i32, %c0_i32_0 : i32, i32
  }
  func.func @transform_4(%arg0: i32) -> (i32, i32, i32) {
    %c0_i32 = arith.constant 0 : i32
    %c0_i32_0 = arith.constant 0 : i32
    %c0_i32_1 = arith.constant 0 : i32
    return %arg0, %c0_i32, %c0_i32_0 : i32, i32, i32
  }
}

</mosaic_0001>

<bundles_post_ra>
// kernel: tpu_custom_call.1
= control target key start
LH: loop header
LB: loop body
LE: loop exit
PB: predicated region body
PF: predicated region fallthrough
CT: control target
= control target key end

     0   :  { %9 = vsyncpa [#allocation3], 0  ;;  %s1378_s0 = inlined_call_operand.hbm [shape: f32[9,1,256], index: 0, kind: input, shape index: {}]   ;;  %s1379_s1 = inlined_call_operand.hbm [shape: f32[2,8,256], index: 1, kind: input, shape index: {}]   ;;  %s1380_s2 = inlined_call_operand.hbm [shape: f32[8,72], index: 2, kind: input, shape index: {}]   ;;  %s1381_s3 = inlined_call_operand.hbm [shape: f32[8,72], index: 3, kind: input, shape index: {}]   ;;  %s1382_s4 = inlined_call_operand.hbm [shape: f32[2,8,256], index: 4, kind: output, shape index: {}]  }
   0x1   :  { %10 = vsyncpa [#allocation6], 0 }
   0x2   :  { %11 = vsyncpa [#allocation9], 0  ;;  %s30_s17 = sshll.u32 %s1379_s1, 4  ;;  %s31_s17 = int_to_ptr.hbm [resolvable:$true] %s30_s17 }
   0x3   :  { %12 = vsyncpa [#allocation4], 0  ;;  %s894_s18 = smov [#allocation5]   ;;  %s17_s22 = sshll.u32 %s1378_s0, 4  ;;  %s18_s22 = int_to_ptr.hbm [resolvable:$true] %s17_s22 }
   0x4   :  { %s32_s19 = sshll.u32 %s894_s18, 4  ;;  %s895_s23 = smov 256   ;;  %s33_s19 = int_to_ptr.vmem [resolvable:$true] %s32_s19 }
   0x5   :  { %s896_s24 = smov 16   ;;  %s897_s25 = smov [#allocation2]  }
   0x6   :  { %38 = dma.hbm_to_vmem [thread:$0]  %s31_s17, 512, %s33_s19, [#allocation6], %s895_s23, %s895_s23, %s896_s24  }
   0x7   :  { %s19_s26 = sshll.u32 %s897_s25, 4  ;;  %s898_s1 = smov 32   ;;  %s20_s26 = int_to_ptr.vmem [resolvable:$true] %s19_s26 }
   0x8   :  { %s899_s27 = smov 2   ;;  %s44_s30 = sshll.u32 %s1380_s2, 4  ;;  %s45_s30 = int_to_ptr.hbm [resolvable:$true] %s44_s30 }
   0x9   :  { %25 = dma.hbm_to_vmem [thread:$0]  %s18_s22, 288, %s20_s26, [#allocation3], %s898_s1, %s898_s1, %s899_s27  }
   0xa   :  { %s900_s5 = smov [#allocation7]   ;;  %s55_s8 = sshll.u32 %s1381_s3, 4  ;;  %s56_s8 = int_to_ptr.hbm [resolvable:$true] %s55_s8 }
   0xb   :  { %s46_s0 = sshll.u32 %s900_s5, 4  ;;  %s901_s9 = smov [#allocation8]   ;;  %s47_s0 = int_to_ptr.vmem [resolvable:$true] %s46_s0 }
   0xc   :  { %49 = dma.hbm_to_vmem [thread:$0]  %s45_s30, 128, %s47_s0, [#allocation6]  }
   0xd   :  { %s57_s10 = sshll.u32 %s901_s9, 4  ;;  %s58_s10 = int_to_ptr.vmem [resolvable:$true] %s57_s10 }
   0xe   :  { %60 = dma.hbm_to_vmem [thread:$0]  %s56_s8, 128, %s58_s10, [#allocation9]  }
   0xf   :  { %886 = dma.done.wait [#allocation3], 288  }
  0x10   :  { %887 = vsyncadd [#allocation3], 4294967008 }
  0x11   :  { %888 = dma.done.wait [#allocation6], 640  }
  0x12   :  { %889 = vsyncadd [#allocation6], 4294966656 }
  0x13   :  { %890 = dma.done.wait [#allocation9], 128  }
  0x14   :  { %891 = vsyncadd [#allocation9], 4294967168  ;;  %v950_v0 = vld [vmem:[#allocation5 + $0x10] sm:$0xff]  ;;  %s902_s2 = smov 112   ;;  %s903_s11 = smov 111   ;;  %v958_v1 = vld [vmem:[#allocation5 + $0x18] sm:$0xff]  ;;  %v102_v9 = vlaneseq }
  0x15   :  { %260 = vrot.lane.b32.xlu1 %v950_v0, %s902_s2  ;;  %268 = vrot.lane.b32.xlu0 %v950_v0, %s903_s11  ;;  %s904_s3 = smov 113   ;;  %s905_s12 = smov 127   ;;  %v972_v2 = vld [vmem:[#allocation5] sm:$0xff]  ;;  %v978_v3 = vld [vmem:[#allocation5 + $0x8] sm:$0xff]  ;;  %v91_v10 = vld [vmem:[#allocation2 + $0x10] sm:$0x3] }
  0x16   :  { %252 = vrot.lane.b32.xlu2 %v950_v0, %s904_s3  ;;  %s906_s13 = smov 1   ;;  %s907_s14 = smov 15   ;;  %v1022_v11 = vand.u32 127, %v102_v9  ;;  %v89_v12 = vld [vmem:[#allocation2 + $0xe] sm:$0x3]  ;;  %v1026_v13 = vperm.slane %v91_v10, 0 }
  0x17   :  { %s908_s15 = smov 17   ;;  %v1028_v14 = vperm.slane %v91_v10, 1  ;;  %v87_v15 = vld [vmem:[#allocation2 + $0xc] sm:$0x3]  ;;  %v1031_v18 = vperm.slane %v89_v12, 0  ;;  %v1033_v19 = vperm.slane %v89_v12, 1 }
  0x18   :  { %vm188_vm0 = vcmp.lt.s32.totalorder %v1022_v11, 112  ;;  %vm202_vm1 = vcmp.lt.s32.totalorder %v1022_v11, 111  ;;  %vm174_vm2 = vcmp.lt.s32.totalorder %v1022_v11, 113  ;;  %v1045_v27 = vperm.slane %v87_v15, 0  ;;  %v85_v31 = vld [vmem:[#allocation2 + $0xa] sm:$0x3] }
  0x19   :  { %v1047_v28 = vperm.slane %v87_v15, 1  ;;  %vm160_vm3 = vcmp.lt.s32.totalorder %v1022_v11, 127  ;;  %v1058_v36 = vperm.slane %v85_v31, 0  ;;  %v1060_v37 = vperm.slane %v85_v31, 1  ;;  %v83_v44 = vld [vmem:[#allocation2 + $0x6] sm:$0x3] }
  0x1a   :  { %vm146_vm4 = vcmp.lt.s32.totalorder %v1022_v11, 1  ;;  %v1071_v46 = vperm.slane %v83_v44, 0  ;;  %v1073_v47 = vperm.slane %v83_v44, 1  ;;  %v81_v58 = vld [vmem:[#allocation2 + $0x4] sm:$0x3]  ;;  %vm132_vm5 = vcmp.lt.s32.totalorder %v1022_v11, 15 }
  0x1b   :  { %v1088_v60 = vperm.slane %v81_v58, 0  ;;  %v1090_v61 = vperm.slane %v81_v58, 1  ;;  %vm118_vm6 = vcmp.lt.s32.totalorder %v1022_v11, 16  ;;  %vm104_vm7 = vcmp.lt.s32.totalorder %v1022_v11, 17  ;;  %s909_s16 = smov [#allocation10]   ;;  %s719_s20 = sshll.u32 %s1382_s4, 4  ;;  %s720_s20 = int_to_ptr.hbm [resolvable:$true] %s719_s20 }
  0x1c   :  { %vm276_vm8 = vcmask 588800   ;;  %s717_s17 = sshll.u32 %s909_s16, 4  ;;  %s718_s17 = int_to_ptr.vmem [resolvable:$true] %s717_s17 }
  0x1d   :  { %262 = vrot.lane.b32.xlu1 %v958_v1, %s902_s2  ;;  %270 = vrot.lane.b32.xlu0 %v958_v1, %s903_s11 }
  0x1e   :  { %254 = vrot.lane.b32.xlu2 %v958_v1, %s904_s3 }
  0x25   :  { %246 = vrot.lane.b32.xlu1 %v958_v1, %s905_s12  ;;  %244 = vrot.lane.b32.xlu0 %v950_v0, %s905_s12 }
  0x26   :  { %236 = vrot.lane.b32.xlu2 %v950_v0, %s906_s13 }
  0x2d   :  { %238 = vrot.lane.b32.xlu0 %v958_v1, %s906_s13  ;;  %198 = vrot.lane.b32.xlu1 %v972_v2, %s903_s11 }
  0x2e   :  { %200 = vrot.lane.b32.xlu2 %v978_v3, %s903_s11 }
  0x35   :  { %228 = vrot.lane.b32.xlu0 %v950_v0, %s907_s14  ;;  %230 = vrot.lane.b32.xlu1 %v958_v1, %s907_s14 }
  0x36   :  { %184 = vrot.lane.b32.xlu2 %v972_v2, %s902_s2 }
  0x3d   :  { %186 = vrot.lane.b32.xlu0 %v978_v3, %s902_s2  ;;  %220 = vrot.lane.b32.xlu1 %v950_v0, %s896_s24 }
  0x3e   :  { %222 = vrot.lane.b32.xlu2 %v958_v1, %s896_s24 }
  0x45   :  { %170 = vrot.lane.b32.xlu0 %v972_v2, %s904_s3  ;;  %172 = vrot.lane.b32.xlu1 %v978_v3, %s904_s3 }
  0x46   :  { %212 = vrot.lane.b32.xlu2 %v950_v0, %s908_s15 }
  0x4d   :  { %214 = vrot.lane.b32.xlu0 %v958_v1, %s908_s15  ;;  %156 = vrot.lane.b32.xlu1 %v972_v2, %s905_s12 }
  0x4e   :  { %158 = vrot.lane.b32.xlu2 %v978_v3, %s905_s12 }
  0x55   :  { %142 = vrot.lane.b32.xlu0 %v972_v2, %s906_s13  ;;  %144 = vrot.lane.b32.xlu1 %v978_v3, %s906_s13 }
  0x56   :  { %128 = vrot.lane.b32.xlu2 %v972_v2, %s907_s14 }
  0x5d   :  { %130 = vrot.lane.b32.xlu0 %v978_v3, %s907_s14  ;;  %114 = vrot.lane.b32.xlu1 %v972_v2, %s896_s24 }
  0x5e   :  { %116 = vrot.lane.b32.xlu2 %v978_v3, %s896_s24 }
  0x65   :  { %98 = vrot.lane.b32.xlu0 %v972_v2, %s908_s15  ;;  %100 = vrot.lane.b32.xlu1 %v978_v3, %s908_s15 }
  0x70   :  { %v253_v4 = vpop.permute.xlu2 %252 }
  0x78   :  { %v255_v5 = vpop.permute.xlu2 %254 }
  0x79   :  { %v256_v29 = vsel %vm174_vm2, %v253_v4, %v255_v5  ;;  %v257_v30 = vsel %vm174_vm2, %v255_v5, %v253_v4 }
  0x7a   :  { %v258_v34 = vmul.f32 %v256_v29, %v1045_v27  ;;  %v259_v35 = vmul.f32 %v257_v30, %v1047_v28 }
  0x80   :  { %v237_v6 = vpop.permute.xlu2 %236 }
  0x87   :  { %v261_v7 = vpop.permute.xlu1 %260  ;;  %v269_v8 = vpop.permute.xlu0 %268 }
  0x88   :  { %v201_v24 = vpop.permute.xlu2 %200 }
  0x8f   :  { %v263_v16 = vpop.permute.xlu1 %262  ;;  %v271_v17 = vpop.permute.xlu0 %270 }
  0x90   :  { %v264_v20 = vsel %vm188_vm0, %v261_v7, %v263_v16  ;;  %v265_v21 = vsel %vm188_vm0, %v263_v16, %v261_v7  ;;  %v272_v22 = vsel %vm202_vm1, %v269_v8, %v271_v17  ;;  %v273_v23 = vsel %vm202_vm1, %v271_v17, %v269_v8  ;;  %v185_v45 = vpop.permute.xlu2 %184 }
  0x91   :  { %v274_v25 = vmul.f32 %v272_v22, %v1026_v13  ;;  %v275_v26 = vmul.f32 %v273_v23, %v1028_v14  ;;  %v266_v32 = vmul.f32 %v264_v20, %v1031_v18  ;;  %v267_v33 = vmul.f32 %v265_v21, %v1033_v19 }
  0x93   :  { %327 = vmatpush.msra.mxu2 %v274_v25  ;;  %347 = vmatpush.msra.mxu3 %v275_v26 }
  0x95   :  { %328 = vmatpush.msra.mxu2 %v266_v32  ;;  %348 = vmatpush.msra.mxu3 %v267_v33 }
  0x97   :  { %v247_v38 = vpop.permute.xlu1 %246  ;;  %v245_v39 = vpop.permute.xlu0 %244  ;;  %329 = vmatpush.msra.mxu2 %v258_v34  ;;  %349 = vmatpush.msra.mxu3 %v259_v35  ;;  %v77_v34 = vld [vmem:[#allocation2] sm:$0x3] }
  0x98   :  { %v248_v40 = vsel %vm160_vm3, %v245_v39, %v247_v38  ;;  %v249_v41 = vsel %vm160_vm3, %v247_v38, %v245_v39  ;;  %v223_v59 = vpop.permute.xlu2 %222  ;;  %v1122_v35 = vperm.slane %v77_v34, 0  ;;  %v1124_v38 = vperm.slane %v77_v34, 1 }
  0x99   :  { %v250_v42 = vmul.f32 %v248_v40, %v1058_v36  ;;  %v251_v43 = vmul.f32 %v249_v41, %v1060_v37 }
  0x9b   :  { %330 = vmatpush.msra.mxu2 %v250_v42  ;;  %350 = vmatpush.msra.mxu3 %v251_v43 }
  0x9d   :  { %331 = vmatpush.msra.mxu2 %v950_v0  ;;  %351 = vmatpush.msra.mxu3 %v958_v1 }
  0x9f   :  { %v239_v48 = vpop.permute.xlu0 %238  ;;  %v199_v49 = vpop.permute.xlu1 %198 }
  0xa0   :  { %v240_v50 = vsel %vm146_vm4, %v237_v6, %v239_v48  ;;  %v241_v51 = vsel %vm146_vm4, %v239_v48, %v237_v6  ;;  %v203_v52 = vsel %vm202_vm1, %v199_v49, %v201_v24  ;;  %v204_v53 = vsel %vm202_vm1, %v201_v24, %v199_v49  ;;  %v79_v6 = vld [vmem:[#allocation2 + $0x2] sm:$0x3]  ;;  %v213_v9 = vpop.permute.xlu2 %212 }
  0xa1   :  { %v210_v54 = vmul.f32 %v1026_v13, %v203_v52  ;;  %v211_v55 = vmul.f32 %v1028_v14, %v204_v53  ;;  %v242_v56 = vmul.f32 %v241_v51, %v1071_v46  ;;  %v243_v57 = vmul.f32 %v240_v50, %v1073_v47  ;;  %v97_v52 = vld [vmem:[#allocation7] sm:$0xff] }
  0xa2   :  { %v1099_v7 = vperm.slane %v79_v6, 0  ;;  %v1101_v8 = vperm.slane %v79_v6, 1 }
  0xa3   :  { %287 = vmatpush.msra.mxu0 %v210_v54  ;;  %307 = vmatpush.msra.mxu1 %v211_v55 }
  0xa4   :  { %332 = vmatpush.msra.mxu2 %v242_v56  ;;  %352 = vmatpush.msra.mxu3 %v243_v57 }
  0xa7   :  { %v229_v62 = vpop.permute.xlu0 %228  ;;  %v231_v63 = vpop.permute.xlu1 %230 }
  0xa8   :  { %v232_v0 = vsel %vm132_vm5, %v229_v62, %v231_v63  ;;  %v233_v1 = vsel %vm132_vm5, %v231_v63, %v229_v62  ;;  %v159_v33 = vpop.permute.xlu2 %158 }
  0xa9   :  { %v234_v4 = vmul.f32 %v233_v1, %v1088_v60  ;;  %v235_v5 = vmul.f32 %v232_v0, %v1090_v61 }
  0xab   :  { %333 = vmatpush.msra.mxu2 %v234_v4  ;;  %353 = vmatpush.msra.mxu3 %v235_v5 }
  0xaf   :  { %v187_v10 = vpop.permute.xlu0 %186  ;;  %v221_v12 = vpop.permute.xlu1 %220 }
  0xb0   :  { %v189_v15 = vsel %vm188_vm0, %v185_v45, %v187_v10  ;;  %v190_v16 = vsel %vm188_vm0, %v187_v10, %v185_v45  ;;  %v224_v17 = vsel %vm118_vm6, %v221_v12, %v223_v59  ;;  %v225_v20 = vsel %vm118_vm6, %v223_v59, %v221_v12  ;;  %v129_v51 = vpop.permute.xlu2 %128 }
  0xb1   :  { %v196_v21 = vmul.f32 %v1031_v18, %v189_v15  ;;  %v197_v22 = vmul.f32 %v1033_v19, %v190_v16  ;;  %v226_v23 = vmul.f32 %v225_v20, %v1099_v7  ;;  %v227_v24 = vmul.f32 %v224_v17, %v1101_v8 }
  0xb3   :  { %288 = vmatpush.msra.mxu0 %v196_v21  ;;  %308 = vmatpush.msra.mxu1 %v197_v22 }
  0xb4   :  { %334 = vmatpush.msra.mxu2 %v226_v23  ;;  %354 = vmatpush.msra.mxu3 %v227_v24 }
  0xb7   :  { %v171_v25 = vpop.permute.xlu0 %170  ;;  %v173_v26 = vpop.permute.xlu1 %172 }
  0xb8   :  { %v175_v29 = vsel %vm174_vm2, %v171_v25, %v173_v26  ;;  %v176_v30 = vsel %vm174_vm2, %v173_v26, %v171_v25 }
  0xb9   :  { %v182_v31 = vmul.f32 %v1045_v27, %v175_v29  ;;  %v183_v32 = vmul.f32 %v1047_v28, %v176_v30 }
  0xbb   :  { %289 = vmatpush.msra.mxu0 %v182_v31  ;;  %309 = vmatpush.msra.mxu1 %v183_v32 }
  0xbf   :  { %v215_v39 = vpop.permute.xlu0 %214  ;;  %v157_v40 = vpop.permute.xlu1 %156 }
  0xc0   :  { %v216_v41 = vsel %vm104_vm7, %v213_v9, %v215_v39  ;;  %v217_v42 = vsel %vm104_vm7, %v215_v39, %v213_v9  ;;  %v161_v43 = vsel %vm160_vm3, %v157_v40, %v159_v33  ;;  %v162_v44 = vsel %vm160_vm3, %v159_v33, %v157_v40 }
  0xc1   :  { %v168_v45 = vmul.f32 %v1058_v36, %v161_v43  ;;  %v169_v48 = vmul.f32 %v1060_v37, %v162_v44  ;;  %v218_v49 = vmul.f32 %v217_v42, %v1122_v35  ;;  %v219_v50 = vmul.f32 %v216_v41, %v1124_v38 }
  0xc3   :  { %290 = vmatpush.msra.mxu0 %v168_v45  ;;  %310 = vmatpush.msra.mxu1 %v169_v48 }
  0xc4   :  { %335 = vmatpush.msra.mxu2 %v218_v49  ;;  %355 = vmatpush.msra.mxu3 %v219_v50 }
  0xc5   :  { %291 = vmatpush.msra.mxu0 %v972_v2  ;;  %311 = vmatpush.msra.mxu1 %v978_v3  ;;  %v117_v3 = vpop.permute.xlu2 %116 }
  0xc6   :  { %736 = vmatmul.msk.f32.vlgmr.msra.gmra.mxu2 %vm276_vm8, %v97_v52  ;;  %737 = vmatmul.msk.f32.vlgmr.msra.gmra.mxu3 %vm276_vm8, %v97_v52 }
  0xc7   :  { %v143_v53 = vpop.permute.xlu0 %142  ;;  %v145_v54 = vpop.permute.xlu1 %144 }
  0xc8   :  { %v147_v55 = vsel %vm146_vm4, %v143_v53, %v145_v54  ;;  %v148_v56 = vsel %vm146_vm4, %v145_v54, %v143_v53 }
  0xc9   :  { %v154_v57 = vmul.f32 %v1071_v46, %v148_v56  ;;  %v155_v2 = vmul.f32 %v1073_v47, %v147_v55 }
  0xcb   :  { %292 = vmatpush.msra.mxu0 %v154_v57  ;;  %312 = vmatpush.msra.mxu1 %v155_v2 }
  0xcf   :  { %v131_v58 = vpop.permute.xlu0 %130  ;;  %v115_v59 = vpop.permute.xlu1 %114 }
  0xd0   :  { %v133_v62 = vsel %vm132_vm5, %v129_v51, %v131_v58  ;;  %v134_v63 = vsel %vm132_vm5, %v131_v58, %v129_v51  ;;  %v119_v0 = vsel %vm118_vm6, %v115_v59, %v117_v3  ;;  %v120_v1 = vsel %vm118_vm6, %v117_v3, %v115_v59 }
  0xd1   :  { %v140_v4 = vmul.f32 %v1088_v60, %v134_v63  ;;  %v141_v5 = vmul.f32 %v1090_v61, %v133_v62  ;;  %v126_v6 = vmul.f32 %v1099_v7, %v120_v1  ;;  %v127_v9 = vmul.f32 %v1101_v8, %v119_v0 }
  0xd3   :  { %293 = vmatpush.msra.mxu0 %v140_v4  ;;  %313 = vmatpush.msra.mxu1 %v141_v5 }
  0xd5   :  { %294 = vmatpush.msra.mxu0 %v126_v6  ;;  %314 = vmatpush.msra.mxu1 %v127_v9 }
  0xd7   :  { %v99_v10 = vpop.permute.xlu0 %98  ;;  %v101_v12 = vpop.permute.xlu1 %100 }
  0xd8   :  { %v105_v15 = vsel %vm104_vm7, %v99_v10, %v101_v12  ;;  %v106_v16 = vsel %vm104_vm7, %v101_v12, %v99_v10 }
  0xd9   :  { %v112_v17 = vmul.f32 %v1122_v35, %v106_v16  ;;  %v113_v20 = vmul.f32 %v1124_v38, %v105_v15 }
  0xdb   :  { %295 = vmatpush.msra.mxu0 %v112_v17  ;;  %315 = vmatpush.msra.mxu1 %v113_v20 }
  0xdc   :  { %734 = vmatmul.msk.f32.vlgmr.msra.gmra.mxu0 %vm276_vm8, %v97_v52  ;;  %735 = vmatmul.msk.f32.vlgmr.msra.gmra.mxu1 %vm276_vm8, %v97_v52 }
 0x149   :  { %v1168_v21 = vpop.f32.mrf.mxu2  ;;  %v1170_v22 = vpop.f32.mrf.mxu3 }
 0x14a   :  { %v397_v23 = vmul.f32 %v1168_v21, %v1168_v21  ;;  %v398_v24 = vmul.f32 %v1170_v22, %v1170_v22  ;;  %v394_v34 = vadd.f32 %v1170_v22, %v1168_v21 }
 0x14c   :  { %v399_v25 = vadd.f32 %v398_v24, %v397_v23 }
 0x14e   :  { %400 = vadd.xlane.f32.xlu0 %v399_v25 }
 0x159   :  { %v297_v26 = vpop.f32.mrf.mxu0  ;;  %v317_v29 = vpop.f32.mrf.mxu1 }
 0x15a   :  { %v360_v30 = vadd.f32 %v317_v29, %v297_v26  ;;  %v363_v31 = vmul.f32 %v297_v26, %v297_v26  ;;  %v364_v32 = vmul.f32 %v317_v29, %v317_v29 }
 0x15c   :  { %361 = vadd.xlane.f32.xlu1 %v360_v30  ;;  %v365_v33 = vadd.f32 %v364_v32, %v363_v31 }
 0x15e   :  { %366 = vadd.xlane.f32.xlu2 %v365_v33 }
 0x166   :  { %395 = vadd.xlane.f32.xlu2 %v394_v34 }
 0x1c1   :  { %v401_v48 = vpop.xlane.xlu0 %400 }
 0x1c2   :  { %v403_v52 = vmul.f32 0.00390625, %v401_v48 }
 0x1cf   :  { %v362_v39 = vpop.xlane.xlu1 %361 }
 0x1d0   :  { %v368_v40 = vmul.f32 0.00390625, %v362_v39 }
 0x1d1   :  { %v367_v41 = vpop.xlane.xlu2 %366 }
 0x1d2   :  { %v369_v42 = vmul.f32 0.00390625, %v367_v41  ;;  %v370_v43 = vmul.f32 %v368_v40, %v368_v40  ;;  %v373_v0 = vsub.f32 %v297_v26, %v368_v40  ;;  %v374_v1 = vsub.f32 %v317_v29, %v368_v40 }
 0x1d4   :  { %v371_v44 = vsub.f32 %v369_v42, %v370_v43 }
 0x1d6   :  { %v372_v45 = vmax.f32 %v371_v44, 0.0 }
 0x1d8   :  { %v375_v49 = vadd.f32 1e-05, %v372_v45 }
 0x1d9   :  { %v396_v50 = vpop.xlane.xlu2 %395 }
 0x1da   :  { %758 = vrsqrt.f32 %v375_v49  ;;  %v402_v51 = vmul.f32 0.00390625, %v396_v50  ;;  %vm382_vm10 = vweird.f32 %v375_v49 }
 0x1dc   :  { %v404_v53 = vmul.f32 %v402_v51, %v402_v51  ;;  %v408_v26 = vsub.f32 %v1170_v22, %v402_v51  ;;  %v407_v31 = vsub.f32 %v1168_v21, %v402_v51 }
 0x1de   :  { %v405_v54 = vsub.f32 %v403_v52, %v404_v53 }
 0x1e0   :  { %v759_v55 = vpop.eup %758  ;;  %v406_v56 = vmax.f32 %v405_v54, 0.0 }
 0x1e1   :  { %v377_v57 = vmul.f32 %v759_v55, %v375_v49  ;;  %vm383_vm9 = vweird.f32 %v759_v55 }
 0x1e2   :  { %v409_v2 = vadd.f32 1e-05, %v406_v56  ;;  %vm384_vm11 = vmor %vm382_vm10, %vm383_vm9 }
 0x1e3   :  { %v378_v3 = vmul.f32 %v759_v55, %v377_v57 }
 0x1e4   :  { %760 = vrsqrt.f32 %v409_v2  ;;  %vm416_vm14 = vweird.f32 %v409_v2 }
 0x1e5   :  { %v379_v58 = vmul.f32 0.5, %v378_v3 }
 0x1e7   :  { %v380_v59 = vsub.f32 1.5, %v379_v58 }
 0x1e9   :  { %v381_v62 = vmul.f32 %v759_v55, %v380_v59 }
 0x1ea   :  { %v761_v63 = vpop.eup %760 }
 0x1eb   :  { %v385_v4 = vsel %vm384_vm11, %v759_v55, %v381_v62  ;;  %v411_v5 = vmul.f32 %v761_v63, %v409_v2  ;;  %vm417_vm15 = vweird.f32 %v761_v63 }
 0x1ec   :  { %v386_v6 = vmul.f32 %v385_v4, %v373_v0  ;;  %v387_v9 = vmul.f32 %v385_v4, %v374_v1  ;;  %vm418_vm9 = vmor %vm416_vm14, %vm417_vm15 }
 0x1ed   :  { %v412_v10 = vmul.f32 %v761_v63, %v411_v5 }
 0x1ee   :  { %vm388_vm12 = vcmp.ge.f32.partialorder %v386_v6, 0.0  ;;  %vm389_vm13 = vcmp.ge.f32.partialorder %v387_v9, 0.0  ;;  %v390_v12 = vmul.f32 0.01, %v386_v6  ;;  %v391_v15 = vmul.f32 0.01, %v387_v9 }
 0x1ef   :  { %v413_v20 = vmul.f32 0.5, %v412_v10 }
 0x1f0   :  { %v1178_v16 = vsel %vm388_vm12, %v386_v6, %v390_v12  ;;  %v1180_v17 = vsel %vm389_vm13, %v387_v9, %v391_v15 }
 0x1f1   :  { %479 = vrot.lane.b32.xlu1 %v1180_v17, %s902_s2  ;;  %487 = vrot.lane.b32.xlu2 %v1180_v17, %s903_s11  ;;  %v414_v23 = vsub.f32 1.5, %v413_v20 }
 0x1f2   :  { %485 = vrot.lane.b32.xlu0 %v1178_v16, %s903_s11 }
 0x1f3   :  { %v415_v24 = vmul.f32 %v761_v63, %v414_v23 }
 0x1f5   :  { %v419_v25 = vsel %vm418_vm9, %v761_v63, %v415_v24 }
 0x1f6   :  { %v421_v29 = vmul.f32 %v419_v25, %v408_v26  ;;  %v420_v32 = vmul.f32 %v419_v25, %v407_v31 }
 0x1f8   :  { %v425_v30 = vmul.f32 0.01, %v421_v29  ;;  %vm423_vm10 = vcmp.ge.f32.partialorder %v421_v29, 0.0  ;;  %v424_v22 = vmul.f32 0.01, %v420_v32  ;;  %vm422_vm11 = vcmp.ge.f32.partialorder %v420_v32, 0.0 }
 0x1f9   :  { %463 = vrot.lane.b32.xlu1 %v1180_v17, %s905_s12  ;;  %477 = vrot.lane.b32.xlu2 %v1178_v16, %s902_s2 }
 0x1fa   :  { %469 = vrot.lane.b32.xlu0 %v1178_v16, %s904_s3  ;;  %v1202_v33 = vsel %vm423_vm10, %v421_v29, %v425_v30  ;;  %v1210_v34 = vsel %vm422_vm11, %v420_v32, %v424_v22 }
 0x201   :  { %455 = vrot.lane.b32.xlu1 %v1180_v17, %s906_s13  ;;  %471 = vrot.lane.b32.xlu2 %v1180_v17, %s904_s3 }
 0x202   :  { %447 = vrot.lane.b32.xlu0 %v1180_v17, %s907_s14 }
 0x209   :  { %445 = vrot.lane.b32.xlu1 %v1178_v16, %s907_s14  ;;  %461 = vrot.lane.b32.xlu2 %v1178_v16, %s905_s12 }
 0x20a   :  { %551 = vrot.lane.b32.xlu0 %v1202_v33, %s903_s11 }
 0x211   :  { %541 = vrot.lane.b32.xlu1 %v1210_v34, %s902_s2  ;;  %453 = vrot.lane.b32.xlu2 %v1178_v16, %s906_s13 }
 0x212   :  { %543 = vrot.lane.b32.xlu0 %v1202_v33, %s902_s2 }
 0x219   :  { %535 = vrot.lane.b32.xlu1 %v1202_v33, %s904_s3  ;;  %437 = vrot.lane.b32.xlu2 %v1178_v16, %s896_s24 }
 0x21a   :  { %527 = vrot.lane.b32.xlu0 %v1202_v33, %s905_s12 }
 0x221   :  { %525 = vrot.lane.b32.xlu1 %v1210_v34, %s905_s12  ;;  %549 = vrot.lane.b32.xlu2 %v1210_v34, %s903_s11 }
 0x222   :  { %519 = vrot.lane.b32.xlu0 %v1202_v33, %s906_s13 }
 0x229   :  { %517 = vrot.lane.b32.xlu1 %v1210_v34, %s906_s13  ;;  %533 = vrot.lane.b32.xlu2 %v1210_v34, %s904_s3 }
 0x22a   :  { %509 = vrot.lane.b32.xlu0 %v1210_v34, %s907_s14 }
 0x231   :  { %501 = vrot.lane.b32.xlu1 %v1210_v34, %s896_s24  ;;  %511 = vrot.lane.b32.xlu2 %v1202_v33, %s907_s14 }
 0x232   :  { %503 = vrot.lane.b32.xlu0 %v1202_v33, %s896_s24 }
 0x239   :  { %439 = vrot.lane.b32.xlu1 %v1180_v17, %s896_s24  ;;  %495 = vrot.lane.b32.xlu2 %v1202_v33, %s908_s15 }
 0x23a   :  { %493 = vrot.lane.b32.xlu0 %v1210_v34, %s908_s15 }
 0x241   :  { %431 = vrot.lane.b32.xlu2 %v1180_v17, %s908_s15 }
 0x242   :  { %429 = vrot.lane.b32.xlu0 %v1178_v16, %s908_s15 }
 0x24b   :  { %v488_v21 = vpop.permute.xlu2 %487 }
 0x253   :  { %v478_v39 = vpop.permute.xlu2 %477 }
 0x25b   :  { %v472_v40 = vpop.permute.xlu2 %471 }
 0x263   :  { %v480_v41 = vpop.permute.xlu1 %479  ;;  %v462_v42 = vpop.permute.xlu2 %461 }
 0x264   :  { %v486_v43 = vpop.permute.xlu0 %485  ;;  %v481_v44 = vsel %vm188_vm0, %v478_v39, %v480_v41  ;;  %v482_v45 = vsel %vm188_vm0, %v480_v41, %v478_v39 }
 0x265   :  { %v489_v48 = vsel %vm202_vm1, %v486_v43, %v488_v21  ;;  %v490_v49 = vsel %vm202_vm1, %v488_v21, %v486_v43  ;;  %v483_v52 = vmul.f32 %v481_v44, %v1031_v18  ;;  %v484_v53 = vmul.f32 %v482_v45, %v1033_v19 }
 0x266   :  { %v491_v50 = vmul.f32 %v489_v48, %v1026_v13  ;;  %v492_v51 = vmul.f32 %v490_v49, %v1028_v14 }
 0x268   :  { %567 = vmatpush.msrb.mxu0 %v491_v50  ;;  %587 = vmatpush.msrb.mxu1 %v492_v51 }
 0x26a   :  { %568 = vmatpush.msrb.mxu0 %v483_v52  ;;  %588 = vmatpush.msrb.mxu1 %v484_v53 }
 0x26b   :  { %v464_v54 = vpop.permute.xlu1 %463  ;;  %v454_v55 = vpop.permute.xlu2 %453 }
 0x26c   :  { %v470_v56 = vpop.permute.xlu0 %469  ;;  %v465_v57 = vsel %vm160_vm3, %v462_v42, %v464_v54  ;;  %v466_v2 = vsel %vm160_vm3, %v464_v54, %v462_v42 }
 0x26d   :  { %v473_v3 = vsel %vm174_vm2, %v470_v56, %v472_v40  ;;  %v474_v58 = vsel %vm174_vm2, %v472_v40, %v470_v56  ;;  %v467_v63 = vmul.f32 %v465_v57, %v1058_v36  ;;  %v468_v0 = vmul.f32 %v466_v2, %v1060_v37 }
 0x26e   :  { %v475_v59 = vmul.f32 %v473_v3, %v1045_v27  ;;  %v476_v62 = vmul.f32 %v474_v58, %v1047_v28 }
 0x270   :  { %569 = vmatpush.msrb.mxu0 %v475_v59  ;;  %589 = vmatpush.msrb.mxu1 %v476_v62 }
 0x272   :  { %570 = vmatpush.msrb.mxu0 %v467_v63  ;;  %590 = vmatpush.msrb.mxu1 %v468_v0 }
 0x273   :  { %v456_v1 = vpop.permute.xlu1 %455  ;;  %v1276_v4 = vpop.permute.xlu2 %437 }
 0x274   :  { %v457_v5 = vsel %vm146_vm4, %v454_v55, %v456_v1  ;;  %v458_v6 = vsel %vm146_vm4, %v456_v1, %v454_v55  ;;  %571 = vmatpush.msrb.mxu0 %v1178_v16  ;;  %591 = vmatpush.msrb.mxu1 %v1180_v17  ;;  %v448_v9 = vpop.permute.xlu0 %447 }
 0x275   :  { %v459_v10 = vmul.f32 %v458_v6, %v1071_v46  ;;  %v460_v12 = vmul.f32 %v457_v5, %v1073_v47 }
 0x277   :  { %572 = vmatpush.msrb.mxu0 %v459_v10  ;;  %592 = vmatpush.msrb.mxu1 %v460_v12 }
 0x27b   :  { %v446_v15 = vpop.permute.xlu1 %445  ;;  %v550_v20 = vpop.permute.xlu2 %549 }
 0x27c   :  { %v449_v23 = vsel %vm132_vm5, %v446_v15, %v448_v9  ;;  %v450_v24 = vsel %vm132_vm5, %v448_v9, %v446_v15  ;;  %v552_v25 = vpop.permute.xlu0 %551  ;;  %v428_v15 = vld [vmem:[#allocation8] sm:$0xff] }
 0x27d   :  { %v553_v16 = vsel %vm202_vm1, %v550_v20, %v552_v25  ;;  %v554_v17 = vsel %vm202_vm1, %v552_v25, %v550_v20  ;;  %v451_v26 = vmul.f32 %v450_v24, %v1088_v60  ;;  %v452_v29 = vmul.f32 %v449_v23, %v1090_v61 }
 0x27e   :  { %v555_v30 = vmul.f32 %v553_v16, %v1026_v13  ;;  %v556_v31 = vmul.f32 %v554_v17, %v1028_v14 }
 0x27f   :  { %573 = vmatpush.msrb.mxu0 %v451_v26  ;;  %593 = vmatpush.msrb.mxu1 %v452_v29 }
 0x280   :  { %607 = vmatpush.msrb.mxu2 %v555_v30  ;;  %627 = vmatpush.msrb.mxu3 %v556_v31 }
 0x283   :  { %v542_v32 = vpop.permute.xlu1 %541  ;;  %v534_v13 = vpop.permute.xlu2 %533 }
 0x284   :  { %v544_v22 = vpop.permute.xlu0 %543 }
 0x285   :  { %v545_v21 = vsel %vm188_vm0, %v542_v32, %v544_v22  ;;  %v546_v39 = vsel %vm188_vm0, %v544_v22, %v542_v32 }
 0x286   :  { %v547_v40 = vmul.f32 %v545_v21, %v1031_v18  ;;  %v548_v41 = vmul.f32 %v546_v39, %v1033_v19 }
 0x288   :  { %608 = vmatpush.msrb.mxu2 %v547_v40  ;;  %628 = vmatpush.msrb.mxu3 %v548_v41 }
 0x28b   :  { %v536_v14 = vpop.permute.xlu1 %535 }
 0x28c   :  { %v537_v42 = vsel %vm174_vm2, %v534_v13, %v536_v14  ;;  %v538_v43 = vsel %vm174_vm2, %v536_v14, %v534_v13  ;;  %v528_v44 = vpop.permute.xlu0 %527 }
 0x28d   :  { %v539_v45 = vmul.f32 %v537_v42, %v1045_v27  ;;  %v540_v48 = vmul.f32 %v538_v43, %v1047_v28  ;;  %v512_v28 = vpop.permute.xlu2 %511 }
 0x28f   :  { %609 = vmatpush.msrb.mxu2 %v539_v45  ;;  %629 = vmatpush.msrb.mxu3 %v540_v48 }
 0x293   :  { %v526_v18 = vpop.permute.xlu1 %525 }
 0x294   :  { %v529_v19 = vsel %vm160_vm3, %v526_v18, %v528_v44  ;;  %v530_v49 = vsel %vm160_vm3, %v528_v44, %v526_v18  ;;  %v520_v50 = vpop.permute.xlu0 %519 }
 0x295   :  { %v531_v51 = vmul.f32 %v529_v19, %v1058_v36  ;;  %v532_v52 = vmul.f32 %v530_v49, %v1060_v37  ;;  %v496_v62 = vpop.permute.xlu2 %495 }
 0x297   :  { %610 = vmatpush.msrb.mxu2 %v531_v51  ;;  %630 = vmatpush.msrb.mxu3 %v532_v52 }
 0x299   :  { %611 = vmatpush.msrb.mxu2 %v1210_v34  ;;  %631 = vmatpush.msrb.mxu3 %v1202_v33 }
 0x29b   :  { %v518_v27 = vpop.permute.xlu1 %517 }
 0x29c   :  { %v521_v53 = vsel %vm146_vm4, %v518_v27, %v520_v50  ;;  %v522_v54 = vsel %vm146_vm4, %v520_v50, %v518_v27  ;;  %v510_v55 = vpop.permute.xlu0 %509 }
 0x29d   :  { %v513_v36 = vsel %vm132_vm5, %v510_v55, %v512_v28  ;;  %v514_v37 = vsel %vm132_vm5, %v512_v28, %v510_v55  ;;  %v523_v56 = vmul.f32 %v522_v54, %v1071_v46  ;;  %v524_v34 = vmul.f32 %v521_v53, %v1073_v47 }
 0x29e   :  { %v515_v33 = vmul.f32 %v514_v37, %v1088_v60  ;;  %v516_v57 = vmul.f32 %v513_v36, %v1090_v61 }
 0x29f   :  { %612 = vmatpush.msrb.mxu2 %v523_v56  ;;  %632 = vmatpush.msrb.mxu3 %v524_v34 }
 0x2a1   :  { %613 = vmatpush.msrb.mxu2 %v515_v33  ;;  %633 = vmatpush.msrb.mxu3 %v516_v57 }
 0x2a3   :  { %v502_v2 = vpop.permute.xlu1 %501 }
 0x2a4   :  { %v504_v3 = vpop.permute.xlu0 %503 }
 0x2a5   :  { %v505_v58 = vsel %vm118_vm6, %v502_v2, %v504_v3  ;;  %v506_v59 = vsel %vm118_vm6, %v504_v3, %v502_v2 }
 0x2a6   :  { %v507_v46 = vmul.f32 %v506_v59, %v1099_v7  ;;  %v508_v47 = vmul.f32 %v505_v58, %v1101_v8 }
 0x2a8   :  { %614 = vmatpush.msrb.mxu2 %v507_v46  ;;  %634 = vmatpush.msrb.mxu3 %v508_v47 }
 0x2ab   :  { %v440_v60 = vpop.permute.xlu1 %439 }
 0x2ac   :  { %v441_v61 = vsel %vm118_vm6, %v1276_v4, %v440_v60  ;;  %v442_v63 = vsel %vm118_vm6, %v440_v60, %v1276_v4  ;;  %v494_v0 = vpop.permute.xlu0 %493  ;;  %v432_v4 = vpop.permute.xlu2 %431 }
 0x2ad   :  { %v497_v1 = vsel %vm104_vm7, %v494_v0, %v496_v62  ;;  %v498_v5 = vsel %vm104_vm7, %v496_v62, %v494_v0  ;;  %v443_v6 = vmul.f32 %v442_v63, %v1099_v7  ;;  %v444_v9 = vmul.f32 %v441_v61, %v1101_v8 }
 0x2ae   :  { %v499_v10 = vmul.f32 %v498_v5, %v1122_v35  ;;  %v500_v12 = vmul.f32 %v497_v1, %v1124_v38 }
 0x2af   :  { %574 = vmatpush.msrb.mxu0 %v443_v6  ;;  %594 = vmatpush.msrb.mxu1 %v444_v9 }
 0x2b0   :  { %615 = vmatpush.msrb.mxu2 %v499_v10  ;;  %635 = vmatpush.msrb.mxu3 %v500_v12 }
 0x2b1   :  { %740 = vmatmul.msk.f32.vlgmr.msrb.gmra.mxu2 %vm276_vm8, %v428_v15  ;;  %741 = vmatmul.msk.f32.vlgmr.msrb.gmra.mxu3 %vm276_vm8, %v428_v15 }
 0x2b4   :  { %v430_v20 = vpop.permute.xlu0 %429 }
 0x2b5   :  { %v433_v7 = vsel %vm104_vm7, %v430_v20, %v432_v4  ;;  %v434_v8 = vsel %vm104_vm7, %v432_v4, %v430_v20 }
 0x2b6   :  { %v435_v23 = vmul.f32 %v434_v8, %v1122_v35  ;;  %v436_v24 = vmul.f32 %v433_v7, %v1124_v38 }
 0x2b8   :  { %575 = vmatpush.msrb.mxu0 %v435_v23  ;;  %595 = vmatpush.msrb.mxu1 %v436_v24 }
 0x2b9   :  { %738 = vmatmul.msk.f32.vlgmr.msrb.gmra.mxu0 %vm276_vm8, %v428_v15  ;;  %739 = vmatmul.msk.f32.vlgmr.msrb.gmra.mxu1 %vm276_vm8, %v428_v15 }
 0x334   :  { %v1360_v25 = vpop.f32.mrf.mxu2  ;;  %v1362_v16 = vpop.f32.mrf.mxu3 }
 0x335   :  { %v674_v17 = vadd.f32 %v1362_v16, %v1360_v25  ;;  %v677_v38 = vmul.f32 %v1360_v25, %v1360_v25  ;;  %v678_v31 = vmul.f32 %v1362_v16, %v1362_v16 }
 0x336   :  { %v577_v26 = vpop.f32.mrf.mxu0  ;;  %v597_v11 = vpop.f32.mrf.mxu1 }
 0x337   :  { %v643_v29 = vmul.f32 %v577_v26, %v577_v26  ;;  %v644_v30 = vmul.f32 %v597_v11, %v597_v11  ;;  %675 = vadd.xlane.f32.xlu0 %v674_v17  ;;  %v640_v35 = vadd.f32 %v597_v11, %v577_v26  ;;  %v679_v22 = vadd.f32 %v678_v31, %v677_v38 }
 0x339   :  { %641 = vadd.xlane.f32.xlu1 %v640_v35  ;;  %v645_v32 = vadd.f32 %v644_v30, %v643_v29 }
 0x33b   :  { %646 = vadd.xlane.f32.xlu2 %v645_v32 }
 0x341   :  { %680 = vadd.xlane.f32.xlu1 %v679_v22 }
 0x3aa   :  { %v676_v40 = vpop.xlane.xlu0 %675 }
 0x3ab   :  { %v682_v42 = vmul.f32 0.00390625, %v676_v40 }
 0x3ac   :  { %v642_v21 = vpop.xlane.xlu1 %641 }
 0x3ad   :  { %v648_v39 = vmul.f32 0.00390625, %v642_v21  ;;  %v684_v45 = vmul.f32 %v682_v42, %v682_v42  ;;  %v687_v60 = vsub.f32 %v1360_v25, %v682_v42  ;;  %v688_v61 = vsub.f32 %v1362_v16, %v682_v42 }
 0x3ae   :  { %v647_v41 = vpop.xlane.xlu2 %646 }
 0x3af   :  { %v649_v13 = vmul.f32 0.00390625, %v647_v41  ;;  %v650_v14 = vmul.f32 %v648_v39, %v648_v39  ;;  %v653_v34 = vsub.f32 %v577_v26, %v648_v39  ;;  %v654_v33 = vsub.f32 %v597_v11, %v648_v39 }
 0x3b1   :  { %v651_v43 = vsub.f32 %v649_v13, %v650_v14 }
 0x3b3   :  { %v652_v44 = vmax.f32 %v651_v43, 0.0 }
 0x3b4   :  { %v681_v48 = vpop.xlane.xlu1 %680 }
 0x3b5   :  { %v655_v18 = vadd.f32 1e-05, %v652_v44  ;;  %v683_v19 = vmul.f32 0.00390625, %v681_v48 }
 0x3b7   :  { %762 = vrsqrt.f32 %v655_v18  ;;  %v685_v49 = vsub.f32 %v683_v19, %v684_v45  ;;  %vm662_vm1 = vweird.f32 %v655_v18 }
 0x3b9   :  { %v686_v50 = vmax.f32 %v685_v49, 0.0 }
 0x3bb   :  { %v689_v51 = vadd.f32 1e-05, %v686_v50 }
 0x3bd   :  { %v763_v52 = vpop.eup %762  ;;  %764 = vrsqrt.f32 %v689_v51  ;;  %vm696_vm6 = vweird.f32 %v689_v51 }
 0x3be   :  { %v657_v27 = vmul.f32 %v763_v52, %v655_v18  ;;  %vm663_vm0 = vweird.f32 %v763_v52 }
 0x3bf   :  { %vm664_vm2 = vmor %vm662_vm1, %vm663_vm0 }
 0x3c0   :  { %v658_v28 = vmul.f32 %v763_v52, %v657_v27 }
 0x3c2   :  { %v659_v53 = vmul.f32 0.5, %v658_v28 }
 0x3c3   :  { %v765_v54 = vpop.eup %764 }
 0x3c4   :  { %v660_v55 = vsub.f32 1.5, %v659_v53  ;;  %v691_v36 = vmul.f32 %v765_v54, %v689_v51  ;;  %vm697_vm3 = vweird.f32 %v765_v54 }
 0x3c5   :  { %vm698_vm7 = vmor %vm696_vm6, %vm697_vm3 }
 0x3c6   :  { %v661_v37 = vmul.f32 %v763_v52, %v660_v55  ;;  %v692_v56 = vmul.f32 %v765_v54, %v691_v36 }
 0x3c8   :  { %v665_v57 = vsel %vm664_vm2, %v763_v52, %v661_v37  ;;  %v693_v2 = vmul.f32 0.5, %v692_v56 }
 0x3c9   :  { %v666_v3 = vmul.f32 %v665_v57, %v653_v34  ;;  %v667_v58 = vmul.f32 %v665_v57, %v654_v33 }
 0x3ca   :  { %v694_v59 = vsub.f32 1.5, %v693_v2 }
 0x3cb   :  { %v670_v46 = vmul.f32 0.01, %v666_v3  ;;  %v671_v47 = vmul.f32 0.01, %v667_v58  ;;  %vm668_vm4 = vcmp.ge.f32.partialorder %v666_v3, 0.0  ;;  %vm669_vm5 = vcmp.ge.f32.partialorder %v667_v58, 0.0 }
 0x3cc   :  { %v695_v62 = vmul.f32 %v765_v54, %v694_v59 }
 0x3cd   :  { %v672_v63 = vsel %vm668_vm4, %v666_v3, %v670_v46  ;;  %v673_v0 = vsel %vm669_vm5, %v667_v58, %v671_v47 }
 0x3ce   :  { %v699_v1 = vsel %vm698_vm7, %v765_v54, %v695_v62  ;;  %708 = vst [vmem:[#allocation10] sm:$0xff] %v672_v63 }
 0x3cf   :  { %v700_v5 = vmul.f32 %v699_v1, %v687_v60  ;;  %v701_v6 = vmul.f32 %v699_v1, %v688_v61  ;;  %709 = vst [vmem:[#allocation10 + $0x8] sm:$0xff] %v673_v0 }
 0x3d1   :  { %v704_v9 = vmul.f32 0.01, %v700_v5  ;;  %v705_v10 = vmul.f32 0.01, %v701_v6  ;;  %vm702_vm8 = vcmp.ge.f32.partialorder %v700_v5, 0.0  ;;  %vm703_vm12 = vcmp.ge.f32.partialorder %v701_v6, 0.0 }
 0x3d3   :  { %v706_v12 = vsel %vm702_vm8, %v700_v5, %v704_v9  ;;  %v707_v15 = vsel %vm703_vm12, %v701_v6, %v705_v10 }
 0x3d4   :  { %711 = vst [vmem:[#allocation10 + $0x10] sm:$0xff] %v706_v12 }
 0x3d5   :  { %712 = vst [vmem:[#allocation10 + $0x18] sm:$0xff] %v707_v15 }
 0x3d6   :  { %725 = dma.vmem_to_hbm [thread:$0]  %s718_s17, 512, %s720_s20, [#allocation4], %s895_s23, %s895_s23, %s896_s24  }
 0x3d7   :  { %892 = dma.done.wait [#allocation4], 512  }
 0x3d8   :  { %893 = vsyncadd [#allocation4], 4294966784 }
 0x3d9   :  { %730 = vsyncpa [#allocation3], 1 }
 0x3da   :  { %731 = vsyncpa [#allocation6], 1 }
 0x3db   :  { %732 = vsyncpa [#allocation9], 1 }
 0x3dc   :  { %733 = vsyncpa [#allocation4], 1 }

</bundles_post_ra>
